<compile_context>
chip_gen: v6e
topology: v6e:2x2x1
jax: 0.10.0
libtpu: 0.0.40
codegen_flags: <defaults>
</compile_context>

<pallas_src>
import functools

import jax
import jax.numpy as jnp
from jax.experimental import pallas as pl
from jax.experimental.pallas import tpu as pltpu


def _prompt_concat_kernel(tmpl_ref, vis_ref, out_ref, *, head_len, vis_len,
                          bcast_read):
    """One grid step writes a block of Bb lane-flattened output rows.

    tmpl_ref : (1, head_len + tail_len)   static rows: prefix | ctx_visual | suffix
    vis_ref  : (Bb, vis_len)              per-sample conditioning tokens
    out_ref  : (Bb, head_len + vis_len + tail_len)
    """
    bb, td = out_ref.shape
    tmpl_cols = tmpl_ref.shape[1]
    tail_start = head_len + vis_len

    def replicate(col_lo, col_hi):
        if bcast_read:
            # stride-0 sublane-broadcast read: replication on the vld path,
            # streams vreg-by-vreg straight into the stores.
            return tmpl_ref[pl.ds(0, bb, stride=0), col_lo:col_hi]
        # Fallback: VPU broadcast of the (1, seg) template slice.
        return jnp.broadcast_to(tmpl_ref[:, col_lo:col_hi], (bb, col_hi - col_lo))

    # Three disjoint stores; every column boundary is a multiple of D (=k*128),
    # so all stores are wide unmasked vst and nothing is written twice.
    if head_len > 0:
        out_ref[:, :head_len] = replicate(0, head_len)
    if vis_len > 0:
        out_ref[:, head_len:tail_start] = vis_ref[...]
    if td > tail_start:
        out_ref[:, tail_start:] = replicate(head_len, tmpl_cols)


def _tpu_generation_params():
    """Returns (num_tensorcores, vmem_budget_bytes, vmem_limit_bytes).

    v5e/v6e: 1 TC, 128 MiB physical VMEM -> big blocks, no forced grid split.
    v7x    : 2 TC,  64 MiB physical VMEM -> tighter budget, split the batch
             so both TensorCores are fed via the "parallel" grid axis.
    """
    vmem_cap = 128 << 20
    n_cores = 1
    try:
        info = pltpu.get_tpu_info()
        cap = getattr(info, "vmem_capacity_bytes", None)
        if cap:
            vmem_cap = int(cap)
        for attr in ("num_cores", "tensorcores_per_chip", "num_tensorcores"):
            val = getattr(info, attr, None)
            if val:
                n_cores = int(val)
                break
        else:
            n_cores = 2 if vmem_cap <= (64 << 20) else 1  # v7x proxy
    except Exception:
        pass  # interpret mode / older jax: conservative defaults below
    n_cores = min(max(n_cores, 1), 2)
    if vmem_cap <= (64 << 20):                  # v7x-class part
        return max(n_cores, 2), 24 << 20, 48 << 20
    return n_cores, 48 << 20, 64 << 20          # v5e / v6e


def _choose_batch_block(B, bytes_per_row, row_mult, n_cores, budget_bytes,
                        cap=4096):
    """Largest batch block keeping double-buffered VMEM under budget.

    Blocks are rounded to `row_mult` sublanes (8 f32 / 16 bf16 / 32 int8) so
    packed rows stay unmasked.  On dual-TC parts the batch is split into >=2
    grid steps; on single-TC parts one full-extent block avoids the ~0.35 us
    per-step pipeline overhead.
    """
    bb = budget_bytes // (2 * max(bytes_per_row, 1))   # 2x: double buffering
    bb = max(row_mult, min(cap, bb))
    bb = (bb // row_mult) * row_mult
    if B <= bb:
        if n_cores >= 2 and B >= 2 * row_mult:
            per_core = -(-B // n_cores)                             # ceil
            return min(bb, -(-per_core // row_mult) * row_mult)     # round up
        return B                       # full-extent block (always legal)
    # B > bb: balance block size so the last grid step is not tiny.
    steps = -(-B // bb)
    per_step = -(-B // steps)
    return min(bb, -(-per_step // row_mult) * row_mult)


def reference_forward(prefix, ctx_visual, ctx_vis_features, suffix):
    """Plain XLA broadcast + concat (also used as the small-batch fast path)."""
    B = ctx_vis_features.shape[0]
    pre = jnp.broadcast_to(prefix, (B,) + prefix.shape[1:])
    ctx = jnp.broadcast_to(ctx_visual[None], (B,) + ctx_visual.shape)
    suf = jnp.broadcast_to(suffix, (B,) + suffix.shape[1:])
    return jnp.concatenate([pre, ctx, ctx_vis_features, suf], axis=1)


def prompt_learner_forward(prefix, ctx_visual, ctx_vis_features, suffix,
                           *, batch_block=None, min_pallas_batch=32):
    """Pallas implementation of PromptLearner.forward (visual_with_ctx=True).

    prefix           : (1, 1, D)          token_visual_prefix buffer
    ctx_visual       : (n_ctx, D)         learnable visual context
    ctx_vis_features : (B, n_vis, D)      per-sample conditioning tokens
    suffix           : (1, n_suffix, D)   token_visual_suffix buffer
    returns          : (B, 1 + n_ctx + n_vis + n_suffix, D) with the same
                       dtype-promotion policy as torch.cat / jnp.concatenate.
    """
    B, n_vis, D = ctx_vis_features.shape
    n_prefix = prefix.shape[1]
    n_ctx = ctx_visual.shape[0]
    n_suffix = suffix.shape[1]
    T = n_prefix + n_ctx + n_vis + n_suffix

    out_dtype = jnp.result_type(prefix.dtype, ctx_visual.dtype,
                                ctx_vis_features.dtype, suffix.dtype)
    itemsize = jnp.dtype(out_dtype).itemsize

    # Pure memory copy: for tiny batches or non-lane-aligned widths, the
    # fused XLA broadcast+concat beats a standalone kernel — take that path.
    if D % 128 != 0 or (batch_block is None and B < min_pallas_batch):
        return reference_forward(prefix, ctx_visual, ctx_vis_features, suffix)

    # Static template (prefix | ctx_visual | suffix) built once in XLA.
    # The per-sample segment is NOT included (disjoint stores make it dead).
    template = jnp.concatenate(
        [prefix[0].astype(out_dtype),
         ctx_visual.astype(out_dtype),
         suffix[0].astype(out_dtype)], axis=0)
    tmpl_cols = (T - n_vis) * D
    template = template.reshape(1, tmpl_cols)

    # Lane-flatten (seq, dim): contiguous reshape, no data movement.
    vis_flat = ctx_vis_features.astype(out_dtype).reshape(B, n_vis * D)

    head_len = (n_prefix + n_ctx) * D
    vis_len = n_vis * D

    n_cores, budget_bytes, vmem_limit = _tpu_generation_params()
    row_mult = max(8, 32 // itemsize)        # 8 f32, 16 bf16, 32 int8/fp8
    bytes_per_row = (T * D + vis_len) * itemsize
    if batch_block is not None:
        Bb = min(B, max(row_mult, (batch_block // row_mult) * row_mult))
    else:
        Bb = _choose_batch_block(B, bytes_per_row, row_mult, n_cores,
                                 budget_bytes)
    grid = (pl.cdiv(B, Bb),)

    cost = pl.CostEstimate(
        flops=0, transcendentals=0,
        bytes_accessed=(B * (T * D + vis_len) + template.size) * itemsize)

    def call(bcast_read):
        kernel = functools.partial(_prompt_concat_kernel, head_len=head_len,
                                   vis_len=vis_len, bcast_read=bcast_read)
        return pl.pallas_call(
            kernel,
            out_shape=jax.ShapeDtypeStruct((B, T * D), out_dtype),
            grid_spec=pltpu.PrefetchScalarGridSpec(
                num_scalar_prefetch=0,
                grid=grid,
                in_specs=[
                    # broadcast block: same template regardless of batch step
                    pl.BlockSpec((1, tmpl_cols), lambda b: (0, 0)),
                    # per-batch block of Bb rows
                    pl.BlockSpec((Bb, vis_len), lambda b: (b, 0)),
                ],
                out_specs=pl.BlockSpec((Bb, T * D), lambda b: (b, 0)),
            ),
            compiler_params=pltpu.CompilerParams(
                dimension_semantics=("parallel",),
                vmem_limit_bytes=vmem_limit),
            cost_estimate=cost,
        )(template, vis_flat)

    try:
        out_flat = call(bcast_read=True)
    except Exception:
        # stride-0 sublane-broadcast reads unsupported on this jax/libtpu:
        # same disjoint stores, fed by a VPU broadcast instead.
        out_flat = call(bcast_read=False)

    return out_flat.reshape(B, T, D)


if __name__ == "__main__":
    # Small, module-consistent shapes (CLIP ln_final width, lane-aligned).
    ctx_dim = 128         # ln_final width
    n_ctx_visual = 4      # TRAINER.DECOMP_COCOOP.VISUAL_N_CTX
    n_vis_feat = 3        # per-sample visual ctx tokens
    n_suffix = 8          # EOT + padding token embeddings
    dtype = jnp.float32

    key = jax.random.PRNGKey(0)
    k_pre, k_ctx, k_suf, k1, k2, k3 = jax.random.split(key, 6)

    # Deterministic synthetic parameters / buffers (shapes from __init__):
    token_visual_prefix = jax.random.normal(k_pre, (1, 1, ctx_dim), dtype)
    ctx_visual = 0.02 * jax.random.normal(k_ctx, (n_ctx_visual, ctx_dim), dtype)
    token_visual_suffix = jax.random.normal(k_suf, (1, n_suffix, ctx_dim), dtype)

    T = 1 + n_ctx_visual + n_vis_feat + n_suffix

    # Exercise: tiny batch (XLA fast path), medium batch (Pallas, full or
    # per-core blocks), and a forced small block so the last grid step is
    # ragged (B % Bb != 0) on real hardware.
    cases = ((2, None, k1), (64, None, k2), (24, 16, k3))
    for B, blk, k in cases:
        ctx_vis_features = jax.random.normal(k, (B, n_vis_feat, ctx_dim), dtype)

        out = prompt_learner_forward(
            token_visual_prefix, ctx_visual, ctx_vis_features,
            token_visual_suffix, batch_block=blk)
        out = jax.block_until_ready(out)

        ref = reference_forward(
            token_visual_prefix, ctx_visual, ctx_vis_features,
            token_visual_suffix)

        assert out.shape == (B, T, ctx_dim), (out.shape, (B, T, ctx_dim))
        assert out.dtype == ref.dtype
        assert jnp.allclose(out, ref), f"mismatch vs reference (B={B}, blk={blk})"

    # TODO(synk): scale_factor_* parameters of the module are not used in
    # forward(), so they are intentionally not modeled here.
    print("KERNEL_OK")
</pallas_src>

<mosaic_0001>
module attributes {stable_mosaic.version = 11 : i64} {
  func.func @_prompt_concat_kernel(%arg0: i32, %arg1: memref<1x1664xf32, #tpu.memory_space<vmem>>, %arg2: memref<64x384xf32, #tpu.memory_space<vmem>>, %arg3: memref<64x2048xf32, #tpu.memory_space<vmem>>) attributes {dimension_semantics = [#tpu.dimension_semantics<parallel>], iteration_bounds = array<i64: 1>, scalar_prefetch = 0 : i64, scratch_operands = 0 : i64, tpu.core_type = #tpu.core_type<tc>, window_params = [{pipeline_mode = #tpu.pipeline_mode<synchronous>, transform_indices = @transform_0, window_bounds = array<i64: 1, 1664>}, {transform_indices = @transform_1, window_bounds = array<i64: 64, 384>}, {transform_indices = @transform_2, window_bounds = array<i64: 64, 2048>}]} {
    %c0 = arith.constant 0 : index
    %c0_0 = arith.constant 0 : index
    %0 = tpu.strided_load %arg1[%c0, %c0_0] {strides = array<i32: 0, 1>} : memref<1x1664xf32, #tpu.memory_space<vmem>>, vector<64x640xf32>
    %c0_1 = arith.constant 0 : index
    %c0_2 = arith.constant 0 : index
    %1 = vector.load %arg3[%c0_1, %c0_2] : memref<64x2048xf32, #tpu.memory_space<vmem>>, vector<64x640xf32>
    tpu.vector_store %arg3[%c0_1, %c0_2], %0 {strides = array<i32>} : memref<64x2048xf32, #tpu.memory_space<vmem>>, vector<64x640xf32>,
    %c0_3 = arith.constant 0 : index
    %c0_4 = arith.constant 0 : index
    %2 = vector.load %arg2[%c0_3, %c0_4] : memref<64x384xf32, #tpu.memory_space<vmem>>, vector<64x384xf32>
    %c0_5 = arith.constant 0 : index
    %c640 = arith.constant 640 : index
    %3 = vector.load %arg3[%c0_5, %c640] : memref<64x2048xf32, #tpu.memory_space<vmem>>, vector<64x384xf32>
    tpu.vector_store %arg3[%c0_5, %c640], %2 {strides = array<i32>} : memref<64x2048xf32, #tpu.memory_space<vmem>>, vector<64x384xf32>,
    %c0_6 = arith.constant 0 : index
    %c640_7 = arith.constant 640 : index
    %4 = tpu.strided_load %arg1[%c0_6, %c640_7] {strides = array<i32: 0, 1>} : memref<1x1664xf32, #tpu.memory_space<vmem>>, vector<64x1024xf32>
    %c0_8 = arith.constant 0 : index
    %c1024 = arith.constant 1024 : index
    %5 = vector.load %arg3[%c0_8, %c1024] : memref<64x2048xf32, #tpu.memory_space<vmem>>, vector<64x1024xf32>
    tpu.vector_store %arg3[%c0_8, %c1024], %4 {strides = array<i32>} : memref<64x2048xf32, #tpu.memory_space<vmem>>, vector<64x1024xf32>,
    return
  }
  func.func @transform_0(%arg0: i32) -> (i32, i32) {
    %c0_i32 = arith.constant 0 : i32
    %c0_i32_0 = arith.constant 0 : i32
    %c0_i32_1 = arith.constant 0 : i32
    return %c0_i32, %c0_i32_0 : i32, i32
  }
  func.func @transform_1(%arg0: i32) -> (i32, i32) {
    %c0_i32 = arith.constant 0 : i32
    %c0_i32_0 = arith.constant 0 : i32
    return %arg0, %c0_i32 : i32, i32
  }
  func.func @transform_2(%arg0: i32) -> (i32, i32) {
    %c0_i32 = arith.constant 0 : i32
    %c0_i32_0 = arith.constant 0 : i32
    return %arg0, %c0_i32 : i32, i32
  }
}

module attributes {stable_mosaic.version = 11 : i64} {
  func.func @_prompt_concat_kernel(%arg0: i32, %arg1: memref<1x1664xf32, #tpu.memory_space<vmem>>, %arg2: memref<64x384xf32, #tpu.memory_space<vmem>>, %arg3: memref<64x2048xf32, #tpu.memory_space<vmem>>) attributes {dimension_semantics = [#tpu.dimension_semantics<parallel>], iteration_bounds = array<i64: 1>, scalar_prefetch = 0 : i64, scratch_operands = 0 : i64, tpu.core_type = #tpu.core_type<tc>, window_params = [{pipeline_mode = #tpu.pipeline_mode<synchronous>, transform_indices = @transform_0, window_bounds = array<i64: 1, 1664>}, {transform_indices = @transform_1, window_bounds = array<i64: 64, 384>}, {transform_indices = @transform_2, window_bounds = array<i64: 64, 2048>}]} {
    %c0 = arith.constant 0 : index
    %c0_0 = arith.constant 0 : index
    %0 = vector.load %arg1[%c0, %c0_0] : memref<1x1664xf32, #tpu.memory_space<vmem>>, vector<1x640xf32>
    %1 = vector.shape_cast %0 : vector<1x640xf32> to vector<1x640xf32>
    %2 = vector.broadcast %1 : vector<1x640xf32> to vector<64x640xf32>
    %c0_1 = arith.constant 0 : index
    %c0_2 = arith.constant 0 : index
    %3 = vector.load %arg3[%c0_1, %c0_2] : memref<64x2048xf32, #tpu.memory_space<vmem>>, vector<64x640xf32>
    tpu.vector_store %arg3[%c0_1, %c0_2], %2 {strides = array<i32>} : memref<64x2048xf32, #tpu.memory_space<vmem>>, vector<64x640xf32>,
    %c0_3 = arith.constant 0 : index
    %c0_4 = arith.constant 0 : index
    %4 = vector.load %arg2[%c0_3, %c0_4] : memref<64x384xf32, #tpu.memory_space<vmem>>, vector<64x384xf32>
    %c0_5 = arith.constant 0 : index
    %c640 = arith.constant 640 : index
    %5 = vector.load %arg3[%c0_5, %c640] : memref<64x2048xf32, #tpu.memory_space<vmem>>, vector<64x384xf32>
    tpu.vector_store %arg3[%c0_5, %c640], %4 {strides = array<i32>} : memref<64x2048xf32, #tpu.memory_space<vmem>>, vector<64x384xf32>,
    %c0_6 = arith.constant 0 : index
    %c640_7 = arith.constant 640 : index
    %6 = vector.load %arg1[%c0_6, %c640_7] : memref<1x1664xf32, #tpu.memory_space<vmem>>, vector<1x1024xf32>
    %7 = vector.shape_cast %6 : vector<1x1024xf32> to vector<1x1024xf32>
    %8 = vector.broadcast %7 : vector<1x1024xf32> to vector<64x1024xf32>
    %c0_8 = arith.constant 0 : index
    %c1024 = arith.constant 1024 : index
    %9 = vector.load %arg3[%c0_8, %c1024] : memref<64x2048xf32, #tpu.memory_space<vmem>>, vector<64x1024xf32>
    tpu.vector_store %arg3[%c0_8, %c1024], %8 {strides = array<i32>} : memref<64x2048xf32, #tpu.memory_space<vmem>>, vector<64x1024xf32>,
    return
  }
  func.func @transform_0(%arg0: i32) -> (i32, i32) {
    %c0_i32 = arith.constant 0 : i32
    %c0_i32_0 = arith.constant 0 : i32
    %c0_i32_1 = arith.constant 0 : i32
    return %c0_i32, %c0_i32_0 : i32, i32
  }
  func.func @transform_1(%arg0: i32) -> (i32, i32) {
    %c0_i32 = arith.constant 0 : i32
    %c0_i32_0 = arith.constant 0 : i32
    return %arg0, %c0_i32 : i32, i32
  }
  func.func @transform_2(%arg0: i32) -> (i32, i32) {
    %c0_i32 = arith.constant 0 : i32
    %c0_i32_0 = arith.constant 0 : i32
    return %arg0, %c0_i32 : i32, i32
  }
}

</mosaic_0001>

<bundles_post_ra>
// kernel: tpu_custom_call.1
= control target key start
LH: loop header
LB: loop body
LE: loop exit
PB: predicated region body
PF: predicated region fallthrough
CT: control target
= control target key end

     0   :  { %7 = vsyncpa [#allocation3], 0  ;;  %s428_s0 = inlined_call_operand.hbm [shape: f32[1,1664], index: 0, kind: input, shape index: {}]   ;;  %s429_s1 = inlined_call_operand.hbm [shape: f32[64,384], index: 1, kind: input, shape index: {}]   ;;  %s430_s2 = inlined_call_operand.hbm [shape: f32[64,2048], index: 2, kind: output, shape index: {}]  }
   0x1   :  { %8 = vsyncpa [#allocation6], 0 }
   0x2   :  { %9 = vsyncpa [#allocation4], 0  ;;  %s350_s9 = smov [#allocation2]   ;;  %s351_s11 = smov [#allocation5]  }
   0x3   :  { %s16_s10 = sshll.u32 %s350_s9, 4  ;;  %s25_s12 = sshll.u32 %s351_s11, 4  ;;  %s17_s10 = int_to_ptr.vmem [resolvable:$true] %s16_s10  ;;  %s26_s12 = int_to_ptr.vmem [resolvable:$true] %s25_s12 }
   0x4   :  { %s292_s13 = scalar_lea.vmem %s17_s10, 208  ;;  %s296_s14 = scalar_lea.vmem %s17_s10, 224 }
   0x5   :  { %p293_p0 = scmp.ne.s32.totalorder %s17_s10, %s292_s13  ;;  %p297_p1 = scmp.lt.s32.totalorder %s17_s10, %s17_s10 }
   0x6   :  { %p298_p2 = scmp.lt.s32.totalorder %s296_s14, %s292_s13 }
   0x8   :  { %p299_p3 = por %p298_p2, %p297_p1 }
   0xa   :  { %p300_p4 = pnand %p299_p3, %p293_p0 }
   0xc   :  { %303 = shalt.err (!%p300_p4)
}
   0xd   :  { %19 = dma.hbm_to_vmem [thread:$0]  %s428_s0, 208, %s17_s10, [#allocation3]  }
   0xe   :  { %s312_s17 = scalar_lea.vmem %s26_s12, 3072  ;;  %p317_p6 = scmp.lt.s32.totalorder %s26_s12, %s26_s12 }
   0xf   :  { %p313_p5 = scmp.ne.s32.totalorder %s26_s12, %s312_s17  ;;  %p318_p7 = scmp.lt.s32.totalorder %s312_s17, %s312_s17 }
  0x11   :  { %p319_p8 = por %p318_p7, %p317_p6 }
  0x13   :  { %p320_p9 = pnand %p319_p8, %p313_p5 }
  0x15   :  { %323 = shalt.err (!%p320_p9)
}
  0x16   :  { %s352_s18 = smov 384   ;;  %s353_s19 = smov 24  }
  0x17   :  { %31 = dma.hbm_to_vmem [thread:$0]  %s429_s1, 3072, %s26_s12, [#allocation6], %s352_s18, %s352_s18, %s353_s19  }
  0x18   :  { %344 = dma.done.wait [#allocation3], 208  }
  0x19   :  { %345 = vsyncadd [#allocation3], 4294967088 }
  0x1a   :  { %346 = dma.done.wait [#allocation6], 3072  }
  0x1b   :  { %347 = vsyncadd [#allocation6], 4294964224  ;;  %v40_v0 = vlaneseq  ;;  %v38_v7 = vld [vmem:[#allocation2] sm:$0x1f]  ;;  %v105_v8 = vld [vmem:[#allocation5] sm:$0xff]  ;;  %s354_s0 = smov [#allocation7]  }
  0x1c   :  { %v106_v9 = vld [vmem:[#allocation5 + $0x8] sm:$0xff]  ;;  %129 = vst [vmem:[#allocation7 + $0x28] sm:$0xff] %v105_v8  ;;  %v107_v14 = vld [vmem:[#allocation5 + $0x10] sm:$0xff]  ;;  %v108_v15 = vld [vmem:[#allocation5 + $0x18] sm:$0xff]  ;;  %s264_s1 = sshll.u32 %s354_s0, 4  ;;  %s410_s1 = int_to_ptr.vmem [resolvable:$true] %s264_s1 }
  0x1d   :  { %v378_v1 = vshrl.u32 %v40_v0, 7  ;;  %130 = vst [vmem:[#allocation7 + $0x30] sm:$0xff] %v106_v9  ;;  %v109_v16 = vld [vmem:[#allocation5 + $0x20] sm:$0xff]  ;;  %131 = vst [vmem:[#allocation7 + $0x38] sm:$0xff] %v107_v14  ;;  %v110_v18 = vld [vmem:[#allocation5 + $0x28] sm:$0xff]  ;;  %s324_s22 = scalar_lea.vmem %s410_s1, 16384  ;;  %p329_p11 = scmp.lt.s32.totalorder %s410_s1, %s410_s1 }
  0x1e   :  { %132 = vst [vmem:[#allocation7 + $0xa8] sm:$0xff] %v108_v15  ;;  %133 = vst [vmem:[#allocation7 + $0xb0] sm:$0xff] %v109_v16  ;;  %v111_v19 = vld [vmem:[#allocation5 + $0x30] sm:$0xff]  ;;  %v112_v20 = vld [vmem:[#allocation5 + $0x38] sm:$0xff]  ;;  %p325_p10 = scmp.ne.s32.totalorder %s410_s1, %s324_s22  ;;  %p330_p12 = scmp.lt.s32.totalorder %s324_s22, %s324_s22 }
  0x1f   :  { %v42_v2 = vsub.s32 0, %v378_v1  ;;  %v46_v3 = vsub.s32 1, %v378_v1  ;;  %v50_v4 = vsub.s32 2, %v378_v1  ;;  %v54_v5 = vsub.s32 3, %v378_v1  ;;  %134 = vst [vmem:[#allocation7 + $0xb8] sm:$0xff] %v110_v18  ;;  %135 = vst [vmem:[#allocation7 + $0x128] sm:$0xff] %v111_v19 }
  0x20   :  { %v58_v6 = vsub.s32 4, %v378_v1  ;;  %136 = vst [vmem:[#allocation7 + $0x130] sm:$0xff] %v112_v20  ;;  %v113_v21 = vld [vmem:[#allocation5 + $0x40] sm:$0xff]  ;;  %v114_v22 = vld [vmem:[#allocation5 + $0x48] sm:$0xff]  ;;  %v115_v23 = vld [vmem:[#allocation5 + $0x50] sm:$0xff]  ;;  %v177_v33 = vsub.s32 5, %v378_v1  ;;  %p331_p13 = por %p330_p12, %p329_p11 }
  0x21   :  { %v43_v10 = vrot.slane %v38_v7, %v42_v2  ;;  %v47_v11 = vrot.slane %v38_v7, %v46_v3  ;;  %v51_v12 = vrot.slane %v38_v7, %v50_v4  ;;  %v55_v13 = vrot.slane %v38_v7, %v54_v5  ;;  %137 = vst [vmem:[#allocation7 + $0x138] sm:$0xff] %v113_v21  ;;  %v116_v24 = vld [vmem:[#allocation5 + $0x58] sm:$0xff]  ;;  %v117_v25 = vld [vmem:[#allocation5 + $0x60] sm:$0xff]  ;;  %v118_v26 = vld [vmem:[#allocation5 + $0x68] sm:$0xff] }
  0x22   :  { %v59_v17 = vrot.slane %v38_v7, %v58_v6  ;;  %138 = vst [vmem:[#allocation7 + $0x1a8] sm:$0xff] %v114_v22  ;;  %139 = vst [vmem:[#allocation7 + $0x1b0] sm:$0xff] %v115_v23  ;;  %v119_v27 = vld [vmem:[#allocation5 + $0x70] sm:$0xff]  ;;  %v120_v28 = vld [vmem:[#allocation5 + $0x78] sm:$0xff]  ;;  %v181_v34 = vsub.s32 6, %v378_v1  ;;  %v185_v35 = vsub.s32 7, %v378_v1  ;;  %p332_p0 = pnand %p331_p13, %p325_p10 }
  0x23   :  { %65 = vst [vmem:[#allocation7] sm:$0xff] %v43_v10  ;;  %70 = vst [vmem:[#allocation7 + $0x80] sm:$0xff] %v43_v10  ;;  %v121_v29 = vld [vmem:[#allocation5 + $0x80] sm:$0xff]  ;;  %v122_v30 = vld [vmem:[#allocation5 + $0x88] sm:$0xff] }
  0x24   :  { %75 = vst [vmem:[#allocation7 + $0x100] sm:$0xff] %v43_v10  ;;  %80 = vst [vmem:[#allocation7 + $0x180] sm:$0xff] %v43_v10  ;;  %v123_v31 = vld [vmem:[#allocation5 + $0x90] sm:$0xff]  ;;  %v124_v32 = vld [vmem:[#allocation5 + $0x98] sm:$0xff] }
  0x25   :  { %85 = vst [vmem:[#allocation7 + $0x200] sm:$0xff] %v43_v10  ;;  %90 = vst [vmem:[#allocation7 + $0x280] sm:$0xff] %v43_v10  ;;  %v125_v36 = vld [vmem:[#allocation5 + $0xa0] sm:$0xff]  ;;  %v126_v37 = vld [vmem:[#allocation5 + $0xa8] sm:$0xff] }
  0x26   :  { %95 = vst [vmem:[#allocation7 + $0x300] sm:$0xff] %v43_v10  ;;  %100 = vst [vmem:[#allocation7 + $0x380] sm:$0xff] %v43_v10  ;;  %v127_v38 = vld [vmem:[#allocation5 + $0xb0] sm:$0xff]  ;;  %v128_v39 = vld [vmem:[#allocation5 + $0xb8] sm:$0xff] }
  0x27   :  { %66 = vst [vmem:[#allocation7 + $0x8] sm:$0xff] %v47_v11  ;;  %71 = vst [vmem:[#allocation7 + $0x88] sm:$0xff] %v47_v11  ;;  %v153_v40 = vld [vmem:[#allocation2 + $0x5] sm:$0xff] }
  0x28   :  { %76 = vst [vmem:[#allocation7 + $0x108] sm:$0xff] %v47_v11  ;;  %81 = vst [vmem:[#allocation7 + $0x188] sm:$0xff] %v47_v11  ;;  %v158_v41 = vrot.slane %v153_v40, %v42_v2  ;;  %v162_v42 = vrot.slane %v153_v40, %v46_v3  ;;  %v166_v43 = vrot.slane %v153_v40, %v50_v4 }
  0x29   :  { %86 = vst [vmem:[#allocation7 + $0x208] sm:$0xff] %v47_v11  ;;  %91 = vst [vmem:[#allocation7 + $0x288] sm:$0xff] %v47_v11  ;;  %v170_v44 = vrot.slane %v153_v40, %v54_v5  ;;  %v174_v45 = vrot.slane %v153_v40, %v58_v6  ;;  %v178_v46 = vrot.slane %v153_v40, %v177_v33 }
  0x2a   :  { %96 = vst [vmem:[#allocation7 + $0x308] sm:$0xff] %v47_v11  ;;  %101 = vst [vmem:[#allocation7 + $0x388] sm:$0xff] %v47_v11  ;;  %v182_v47 = vrot.slane %v153_v40, %v181_v34  ;;  %v408_v48 = vrot.slane %v153_v40, %v185_v35 }
  0x2b   :  { %67 = vst [vmem:[#allocation7 + $0x10] sm:$0xff] %v51_v12  ;;  %72 = vst [vmem:[#allocation7 + $0x90] sm:$0xff] %v51_v12 }
  0x2c   :  { %77 = vst [vmem:[#allocation7 + $0x110] sm:$0xff] %v51_v12  ;;  %82 = vst [vmem:[#allocation7 + $0x190] sm:$0xff] %v51_v12 }
  0x2d   :  { %87 = vst [vmem:[#allocation7 + $0x210] sm:$0xff] %v51_v12  ;;  %92 = vst [vmem:[#allocation7 + $0x290] sm:$0xff] %v51_v12 }
  0x2e   :  { %97 = vst [vmem:[#allocation7 + $0x310] sm:$0xff] %v51_v12  ;;  %102 = vst [vmem:[#allocation7 + $0x390] sm:$0xff] %v51_v12 }
  0x2f   :  { %68 = vst [vmem:[#allocation7 + $0x18] sm:$0xff] %v55_v13  ;;  %73 = vst [vmem:[#allocation7 + $0x98] sm:$0xff] %v55_v13 }
  0x30   :  { %78 = vst [vmem:[#allocation7 + $0x118] sm:$0xff] %v55_v13  ;;  %83 = vst [vmem:[#allocation7 + $0x198] sm:$0xff] %v55_v13 }
  0x31   :  { %88 = vst [vmem:[#allocation7 + $0x218] sm:$0xff] %v55_v13  ;;  %93 = vst [vmem:[#allocation7 + $0x298] sm:$0xff] %v55_v13 }
  0x32   :  { %98 = vst [vmem:[#allocation7 + $0x318] sm:$0xff] %v55_v13  ;;  %103 = vst [vmem:[#allocation7 + $0x398] sm:$0xff] %v55_v13 }
  0x33   :  { %69 = vst [vmem:[#allocation7 + $0x20] sm:$0xff] %v59_v17  ;;  %74 = vst [vmem:[#allocation7 + $0xa0] sm:$0xff] %v59_v17 }
  0x34   :  { %79 = vst [vmem:[#allocation7 + $0x120] sm:$0xff] %v59_v17  ;;  %84 = vst [vmem:[#allocation7 + $0x1a0] sm:$0xff] %v59_v17 }
  0x35   :  { %89 = vst [vmem:[#allocation7 + $0x220] sm:$0xff] %v59_v17  ;;  %94 = vst [vmem:[#allocation7 + $0x2a0] sm:$0xff] %v59_v17 }
  0x36   :  { %99 = vst [vmem:[#allocation7 + $0x320] sm:$0xff] %v59_v17  ;;  %104 = vst [vmem:[#allocation7 + $0x3a0] sm:$0xff] %v59_v17 }
  0x37   :  { %140 = vst [vmem:[#allocation7 + $0x1b8] sm:$0xff] %v116_v24  ;;  %141 = vst [vmem:[#allocation7 + $0x228] sm:$0xff] %v117_v25 }
  0x38   :  { %142 = vst [vmem:[#allocation7 + $0x230] sm:$0xff] %v118_v26  ;;  %143 = vst [vmem:[#allocation7 + $0x238] sm:$0xff] %v119_v27 }
  0x39   :  { %144 = vst [vmem:[#allocation7 + $0x2a8] sm:$0xff] %v120_v28  ;;  %145 = vst [vmem:[#allocation7 + $0x2b0] sm:$0xff] %v121_v29 }
  0x3a   :  { %146 = vst [vmem:[#allocation7 + $0x2b8] sm:$0xff] %v122_v30  ;;  %147 = vst [vmem:[#allocation7 + $0x328] sm:$0xff] %v123_v31 }
  0x3b   :  { %148 = vst [vmem:[#allocation7 + $0x330] sm:$0xff] %v124_v32  ;;  %149 = vst [vmem:[#allocation7 + $0x338] sm:$0xff] %v125_v36 }
  0x3c   :  { %150 = vst [vmem:[#allocation7 + $0x3a8] sm:$0xff] %v126_v37  ;;  %151 = vst [vmem:[#allocation7 + $0x3b0] sm:$0xff] %v127_v38 }
  0x3d   :  { %152 = vst [vmem:[#allocation7 + $0x3b8] sm:$0xff] %v128_v39  ;;  %195 = vst [vmem:[#allocation7 + $0x40] sm:$0xff] %v158_v41 }
  0x3e   :  { %203 = vst [vmem:[#allocation7 + $0xc0] sm:$0xff] %v158_v41  ;;  %211 = vst [vmem:[#allocation7 + $0x140] sm:$0xff] %v158_v41 }
  0x3f   :  { %219 = vst [vmem:[#allocation7 + $0x1c0] sm:$0xff] %v158_v41  ;;  %227 = vst [vmem:[#allocation7 + $0x240] sm:$0xff] %v158_v41 }
  0x40   :  { %235 = vst [vmem:[#allocation7 + $0x2c0] sm:$0xff] %v158_v41  ;;  %243 = vst [vmem:[#allocation7 + $0x340] sm:$0xff] %v158_v41 }
  0x41   :  { %251 = vst [vmem:[#allocation7 + $0x3c0] sm:$0xff] %v158_v41  ;;  %196 = vst [vmem:[#allocation7 + $0x48] sm:$0xff] %v162_v42 }
  0x42   :  { %204 = vst [vmem:[#allocation7 + $0xc8] sm:$0xff] %v162_v42  ;;  %212 = vst [vmem:[#allocation7 + $0x148] sm:$0xff] %v162_v42 }
  0x43   :  { %220 = vst [vmem:[#allocation7 + $0x1c8] sm:$0xff] %v162_v42  ;;  %228 = vst [vmem:[#allocation7 + $0x248] sm:$0xff] %v162_v42 }
  0x44   :  { %236 = vst [vmem:[#allocation7 + $0x2c8] sm:$0xff] %v162_v42  ;;  %244 = vst [vmem:[#allocation7 + $0x348] sm:$0xff] %v162_v42 }
  0x45   :  { %252 = vst [vmem:[#allocation7 + $0x3c8] sm:$0xff] %v162_v42  ;;  %197 = vst [vmem:[#allocation7 + $0x50] sm:$0xff] %v166_v43 }
  0x46   :  { %205 = vst [vmem:[#allocation7 + $0xd0] sm:$0xff] %v166_v43  ;;  %213 = vst [vmem:[#allocation7 + $0x150] sm:$0xff] %v166_v43 }
  0x47   :  { %221 = vst [vmem:[#allocation7 + $0x1d0] sm:$0xff] %v166_v43  ;;  %229 = vst [vmem:[#allocation7 + $0x250] sm:$0xff] %v166_v43 }
  0x48   :  { %237 = vst [vmem:[#allocation7 + $0x2d0] sm:$0xff] %v166_v43  ;;  %245 = vst [vmem:[#allocation7 + $0x350] sm:$0xff] %v166_v43 }
  0x49   :  { %253 = vst [vmem:[#allocation7 + $0x3d0] sm:$0xff] %v166_v43  ;;  %198 = vst [vmem:[#allocation7 + $0x58] sm:$0xff] %v170_v44 }
  0x4a   :  { %206 = vst [vmem:[#allocation7 + $0xd8] sm:$0xff] %v170_v44  ;;  %214 = vst [vmem:[#allocation7 + $0x158] sm:$0xff] %v170_v44 }
  0x4b   :  { %222 = vst [vmem:[#allocation7 + $0x1d8] sm:$0xff] %v170_v44  ;;  %230 = vst [vmem:[#allocation7 + $0x258] sm:$0xff] %v170_v44 }
  0x4c   :  { %238 = vst [vmem:[#allocation7 + $0x2d8] sm:$0xff] %v170_v44  ;;  %246 = vst [vmem:[#allocation7 + $0x358] sm:$0xff] %v170_v44 }
  0x4d   :  { %254 = vst [vmem:[#allocation7 + $0x3d8] sm:$0xff] %v170_v44  ;;  %199 = vst [vmem:[#allocation7 + $0x60] sm:$0xff] %v174_v45 }
  0x4e   :  { %207 = vst [vmem:[#allocation7 + $0xe0] sm:$0xff] %v174_v45  ;;  %215 = vst [vmem:[#allocation7 + $0x160] sm:$0xff] %v174_v45 }
  0x4f   :  { %223 = vst [vmem:[#allocation7 + $0x1e0] sm:$0xff] %v174_v45  ;;  %231 = vst [vmem:[#allocation7 + $0x260] sm:$0xff] %v174_v45 }
  0x50   :  { %239 = vst [vmem:[#allocation7 + $0x2e0] sm:$0xff] %v174_v45  ;;  %247 = vst [vmem:[#allocation7 + $0x360] sm:$0xff] %v174_v45 }
  0x51   :  { %255 = vst [vmem:[#allocation7 + $0x3e0] sm:$0xff] %v174_v45  ;;  %200 = vst [vmem:[#allocation7 + $0x68] sm:$0xff] %v178_v46 }
  0x52   :  { %208 = vst [vmem:[#allocation7 + $0xe8] sm:$0xff] %v178_v46  ;;  %216 = vst [vmem:[#allocation7 + $0x168] sm:$0xff] %v178_v46 }
  0x53   :  { %224 = vst [vmem:[#allocation7 + $0x1e8] sm:$0xff] %v178_v46  ;;  %232 = vst [vmem:[#allocation7 + $0x268] sm:$0xff] %v178_v46 }
  0x54   :  { %240 = vst [vmem:[#allocation7 + $0x2e8] sm:$0xff] %v178_v46  ;;  %248 = vst [vmem:[#allocation7 + $0x368] sm:$0xff] %v178_v46 }
  0x55   :  { %256 = vst [vmem:[#allocation7 + $0x3e8] sm:$0xff] %v178_v46  ;;  %201 = vst [vmem:[#allocation7 + $0x70] sm:$0xff] %v182_v47 }
  0x56   :  { %209 = vst [vmem:[#allocation7 + $0xf0] sm:$0xff] %v182_v47  ;;  %217 = vst [vmem:[#allocation7 + $0x170] sm:$0xff] %v182_v47 }
  0x57   :  { %225 = vst [vmem:[#allocation7 + $0x1f0] sm:$0xff] %v182_v47  ;;  %233 = vst [vmem:[#allocation7 + $0x270] sm:$0xff] %v182_v47 }
  0x58   :  { %241 = vst [vmem:[#allocation7 + $0x2f0] sm:$0xff] %v182_v47  ;;  %249 = vst [vmem:[#allocation7 + $0x370] sm:$0xff] %v182_v47 }
  0x59   :  { %257 = vst [vmem:[#allocation7 + $0x3f0] sm:$0xff] %v182_v47  ;;  %202 = vst [vmem:[#allocation7 + $0x78] sm:$0xff] %v408_v48 }
  0x5a   :  { %210 = vst [vmem:[#allocation7 + $0xf8] sm:$0xff] %v408_v48  ;;  %218 = vst [vmem:[#allocation7 + $0x178] sm:$0xff] %v408_v48 }
  0x5b   :  { %226 = vst [vmem:[#allocation7 + $0x1f8] sm:$0xff] %v408_v48  ;;  %234 = vst [vmem:[#allocation7 + $0x278] sm:$0xff] %v408_v48 }
  0x5c   :  { %242 = vst [vmem:[#allocation7 + $0x2f8] sm:$0xff] %v408_v48  ;;  %250 = vst [vmem:[#allocation7 + $0x378] sm:$0xff] %v408_v48 }
  0x5d   :  { %258 = vst [vmem:[#allocation7 + $0x3f8] sm:$0xff] %v408_v48 }
  0x5e   :  { %335 = shalt.err (!%p332_p0)
}
  0x5f   :  { %s355_s23 = smov 2048   ;;  %s356_s24 = smov 128  }
  0x60   :  { %270 = dma.vmem_to_hbm [thread:$0]  %s410_s1, 16384, %s430_s2, [#allocation4], %s355_s23, %s355_s23, %s356_s24  }
  0x61   :  { %348 = dma.done.wait [#allocation4], 16384  }
  0x62   :  { %349 = vsyncadd [#allocation4], 4294950912 }
  0x63   :  { %274 = vsyncpa [#allocation3], 1 }
  0x64   :  { %275 = vsyncpa [#allocation6], 1 }
  0x65   :  { %276 = vsyncpa [#allocation4], 1 }

</bundles_post_ra>
